<compile_context>
chip_gen: v7x
topology: tpu7x:2x2x1
jax: 0.10.0
libtpu: 0.0.40
codegen_flags: <defaults>
</compile_context>

<pallas_src>
import functools

import jax
import jax.numpy as jnp
from jax.experimental import pallas as pl
from jax.experimental.pallas import tpu as pltpu


def _round_up(x, m):
    return ((x + m - 1) // m) * m


def _cdiv(a, b):
    return (a + b - 1) // b


def _leaky_relu(x, slope=0.2):
    return jnp.where(x >= 0, x, slope * x)


# --------------------------------------------------------------------------- kernel
def discriminator_kernel(z_ref, y_ref,
                         w1_ref, b1_ref,
                         w2_ref, b2_ref,
                         wh_ref, bh_ref,
                         mask_ref, out_ref, *, out_pad):
    # Layer 1: bf16 MXU matmul, f32 accumulate; bias + LeakyReLU in f32 (v5e-friendly).
    z = z_ref[...].astype(jnp.bfloat16)            # no-op if already bf16
    h = jnp.dot(z, w1_ref[...], preferred_element_type=jnp.float32)
    h = _leaky_relu(h + b1_ref[...])

    # Layer 2.
    h = jnp.dot(h.astype(jnp.bfloat16), w2_ref[...], preferred_element_type=jnp.float32)
    h = _leaky_relu(h + b2_ref[...])

    # Fused head (one lane-dense MXU pass):
    #   col 0                    -> valid(h)
    #   cols 1 .. 1+C            -> classifier(h)
    #   cols proj .. proj+C      -> h @ projection^T   (packed into spare lanes
    #                               of the same 128-col block when it fits)
    scores = jnp.dot(h.astype(jnp.bfloat16), wh_ref[...],
                     preferred_element_type=jnp.float32) + bh_ref[...]

    # y is pre-shifted in the wrapper so its nonzero (one-hot) columns align with the
    # projection columns of `scores`; every other column of y is zero, so this single
    # reduction computes (projection(y) * h).sum(dim=1).
    proj = jnp.sum(y_ref[...].astype(jnp.float32) * scores, axis=1, keepdims=True)

    # mask_ref is (1, out_pad) with 1.0 only in column 0 (the validity column).
    out_ref[...] = (scores[:, :out_pad] + proj * mask_ref[...]).astype(out_ref.dtype)


# --------------------------------------------------------------------------- params
def prepare_params(params):
    """Pad to (8,128)-friendly shapes, fuse head matmuls, cast MXU operands to bf16."""
    w1, b1 = params["w1"], params["b1"]
    w2, b2 = params["w2"], params["b2"]
    wv, bv = params["wv"], params["bv"]
    wc, bc = params["wc"], params["bc"]
    wp = params["wp"]

    feature_dim, hidden_dim = w1.shape
    num_classes = wc.shape[1]

    f_pad = _round_up(feature_dim, 128)
    h_pad = _round_up(hidden_dim, 128)
    out_pad = _round_up(1 + num_classes, 128)

    # Pack projection^T into spare lanes of the same head block when it fits,
    # otherwise append a separate 128-aligned region.
    if 1 + 2 * num_classes <= out_pad:
        proj_start = 1 + num_classes
        head_pad = out_pad
    else:
        proj_start = out_pad
        head_pad = out_pad + _round_up(num_classes, 128)

    def pad2(a, r, c):
        return jnp.pad(a, ((0, r - a.shape[0]), (0, c - a.shape[1])))

    w1p = pad2(w1, f_pad, h_pad)
    b1p = pad2(b1, 1, h_pad)
    w2p = pad2(w2, h_pad, h_pad)
    b2p = pad2(b2, 1, h_pad)

    # Fused head weight: [ valid | classifier | projection^T ], zero elsewhere.
    wh = jnp.zeros((h_pad, head_pad), jnp.float32)
    wh = wh.at[:hidden_dim, 0:1].set(wv)
    wh = wh.at[:hidden_dim, 1:1 + num_classes].set(wc)
    wh = wh.at[:hidden_dim, proj_start:proj_start + num_classes].set(wp.T)
    bh = jnp.zeros((1, head_pad), jnp.float32)
    bh = bh.at[:, 0:1].set(bv)
    bh = bh.at[:, 1:1 + num_classes].set(bc)

    mask = jnp.zeros((1, out_pad), jnp.float32).at[0, 0].set(1.0)

    return {
        "w1": w1p.astype(jnp.bfloat16), "b1": b1p.astype(jnp.float32),
        "w2": w2p.astype(jnp.bfloat16), "b2": b2p.astype(jnp.float32),
        "wh": wh.astype(jnp.bfloat16), "bh": bh.astype(jnp.float32),
        "mask": mask,
        "dims": (feature_dim, hidden_dim, num_classes,
                 f_pad, h_pad, out_pad, head_pad, proj_start),
    }


# --------------------------------------------------------------------------- wrapper
def _choose_tiling(B, max_tile=1024):
    num_tiles = max(1, _cdiv(B, max_tile))
    if num_tiles == 1 and B >= 512:
        num_tiles = 2                      # give both v7x TensorCores work
    if num_tiles > 1 and num_tiles % 2 == 1:
        num_tiles += 1                     # even tile count shards cleanly across 2 TCs
    tile_b = _round_up(_cdiv(B, num_tiles), 16)   # 16: bf16 packs 2 rows per sublane
    return tile_b, tile_b * num_tiles, num_tiles


def _vmem_limit_bytes(tile_b, f_pad, h_pad, head_pad, out_pad, z_itemsize):
    # Weights (bf16) + biases/mask (f32); generous 2x even though weights are
    # single-buffered, plus triple-counted activation tiles and fixed headroom.
    w_bytes = 2 * (f_pad * h_pad + h_pad * h_pad + h_pad * head_pad) \
        + 4 * (2 * h_pad + head_pad + out_pad)
    act_bytes = tile_b * (f_pad * z_itemsize + 2 * head_pad + 2 * out_pad)
    total = 2 * w_bytes + 3 * act_bytes + (4 << 20)
    # TODO(synk): for very large hidden_dim (w2 ~ h_pad^2 bf16), add a K grid axis
    # with a VMEM accumulator instead of keeping w2 fully resident on v7x (64 MiB).
    return int(min(max(total, 16 << 20), 64 << 20))


def discriminator_forward(z, y, prep, max_tile=1024):
    (feature_dim, hidden_dim, num_classes,
     f_pad, h_pad, out_pad, head_pad, proj_start) = prep["dims"]

    B = z.shape[0]
    tile_b, b_pad, num_tiles = _choose_tiling(B, max_tile)

    # Pad z only when its shape actually needs it; otherwise stream as-is and let
    # the kernel cast to bf16 (avoids an extra wrapper-side HBM round-trip).
    if b_pad != B or f_pad != feature_dim:
        z_p = jnp.pad(z, ((0, b_pad - B), (0, f_pad - feature_dim))).astype(jnp.bfloat16)
    else:
        z_p = z

    # Shift y so its columns align with the projection columns of the fused head;
    # one-hot labels are exact in bf16, which halves the y HBM stream vs f32.
    y_p = jnp.pad(
        y, ((0, b_pad - B), (proj_start, head_pad - proj_start - num_classes))
    ).astype(jnp.bfloat16)

    kernel = functools.partial(discriminator_kernel, out_pad=out_pad)
    vmem_bytes = _vmem_limit_bytes(tile_b, f_pad, h_pad, head_pad, out_pad,
                                   jnp.dtype(z_p.dtype).itemsize)

    def run(single_buffer_weights):
        def const_spec(shape):
            # Resident weights/biases: constant index map; single-buffer to avoid a
            # dead second VMEM copy.
            if single_buffer_weights:
                return pl.BlockSpec(shape, lambda i: (0, 0),
                                    pipeline_mode=pl.Buffered(1))
            return pl.BlockSpec(shape, lambda i: (0, 0))

        return pl.pallas_call(
            kernel,
            out_shape=jax.ShapeDtypeStruct((b_pad, out_pad), jnp.bfloat16),
            grid_spec=pltpu.PrefetchScalarGridSpec(
                num_scalar_prefetch=0,
                grid=(num_tiles,),
                in_specs=[
                    pl.BlockSpec((tile_b, f_pad), lambda i: (i, 0)),      # z tile
                    pl.BlockSpec((tile_b, head_pad), lambda i: (i, 0)),   # shifted y tile
                    const_spec((f_pad, h_pad)),                           # w1 (resident)
                    const_spec((1, h_pad)),                               # b1
                    const_spec((h_pad, h_pad)),                           # w2 (resident)
                    const_spec((1, h_pad)),                               # b2
                    const_spec((h_pad, head_pad)),                        # fused head W
                    const_spec((1, head_pad)),                            # fused head b
                    const_spec((1, out_pad)),                             # validity-col mask
                ],
                out_specs=pl.BlockSpec((tile_b, out_pad), lambda i: (i, 0)),
            ),
            compiler_params=pltpu.CompilerParams(
                dimension_semantics=("parallel",),      # megacore sharding on v7x
                vmem_limit_bytes=vmem_bytes,
            ),
        )(z_p, y_p, prep["w1"], prep["b1"], prep["w2"], prep["b2"],
          prep["wh"], prep["bh"], prep["mask"])

    try:
        out = run(single_buffer_weights=True)
    except Exception:
        # TODO(synk): fallback if pipeline_mode=pl.Buffered(1) is unsupported here.
        out = run(single_buffer_weights=False)

    out = out[:B].astype(jnp.float32)
    validity = out[:, 0:1]
    logits = out[:, 1:1 + num_classes]
    return validity, logits


# --------------------------------------------------------------------------- params / reference
def spectral_normalize(w):
    # w is (in_dim, out_dim); torch's spectral_norm divides by the largest singular value.
    # TODO(synk): torch uses (non-converged) power iteration during training; exact sigma here.
    sigma = jnp.linalg.norm(w, ord=2)
    return w / sigma


def init_params(key, feature_dim, hidden_dim, num_classes):
    ks = jax.random.split(key, 7)
    scale = 0.05
    # Weights stored as (in_dim, out_dim) — transposed vs. torch's (out, in).
    w1 = scale * jax.random.normal(ks[0], (feature_dim, hidden_dim), jnp.float32)
    w2 = scale * jax.random.normal(ks[1], (hidden_dim, hidden_dim), jnp.float32)
    wv = scale * jax.random.normal(ks[2], (hidden_dim, 1), jnp.float32)
    wc = scale * jax.random.normal(ks[3], (hidden_dim, num_classes), jnp.float32)
    wp = scale * jax.random.normal(ks[4], (num_classes, hidden_dim), jnp.float32)
    b1 = scale * jax.random.normal(ks[5], (1, hidden_dim), jnp.float32)
    b2 = scale * jax.random.normal(ks[6], (1, hidden_dim), jnp.float32)
    bv = jnp.zeros((1, 1), jnp.float32)
    bc = jnp.zeros((1, num_classes), jnp.float32)
    return {
        "w1": spectral_normalize(w1), "b1": b1,
        "w2": spectral_normalize(w2), "b2": b2,
        "wv": wv, "bv": bv,
        "wc": wc, "bc": bc,
        "wp": wp,
    }


def reference_forward(z, y, p):
    h = _leaky_relu(z @ p["w1"] + p["b1"])
    h = _leaky_relu(h @ p["w2"] + p["b2"])
    var = y @ p["wp"]
    validity = jnp.sum(var * h, axis=1, keepdims=True) + (h @ p["wv"] + p["bv"])
    logits = h @ p["wc"] + p["bc"]
    return validity, logits


# --------------------------------------------------------------------------- demo
if __name__ == "__main__":
    B, feature_dim, hidden_dim, num_classes = 2, 16, 32, 8

    key = jax.random.PRNGKey(0)
    kz, ky, kp = jax.random.split(key, 3)

    z = jax.random.normal(kz, (B, feature_dim), jnp.float32)
    labels = jax.random.randint(ky, (B,), 0, num_classes)
    y = jax.nn.one_hot(labels, num_classes, dtype=jnp.float32)

    params = init_params(kp, feature_dim, hidden_dim, num_classes)
    prep = prepare_params(params)

    validity, logits = discriminator_forward(z, y, prep)
    jax.block_until_ready((validity, logits))

    ref_v, ref_l = reference_forward(z, y, params)   # pure-f32 reference
    assert validity.shape == (B, 1) and logits.shape == (B, num_classes)
    # bf16 MXU matmuls / bf16 output store -> small rounding vs. the f32 reference.
    assert jnp.allclose(validity, ref_v, atol=2e-2, rtol=2e-2)
    assert jnp.allclose(logits, ref_l, atol=2e-2, rtol=2e-2)

    print("KERNEL_OK")
</pallas_src>

<mosaic_0001>
module attributes {stable_mosaic.version = 11 : i64} {
  func.func @discriminator_kernel(%arg0: i32, %arg1: memref<16x128xbf16, #tpu.memory_space<vmem>>, %arg2: memref<16x128xbf16, #tpu.memory_space<vmem>>, %arg3: memref<128x128xbf16, #tpu.memory_space<vmem>>, %arg4: memref<1x128xf32, #tpu.memory_space<vmem>>, %arg5: memref<128x128xbf16, #tpu.memory_space<vmem>>, %arg6: memref<1x128xf32, #tpu.memory_space<vmem>>, %arg7: memref<128x128xbf16, #tpu.memory_space<vmem>>, %arg8: memref<1x128xf32, #tpu.memory_space<vmem>>, %arg9: memref<1x128xf32, #tpu.memory_space<vmem>>, %arg10: memref<16x128xbf16, #tpu.memory_space<vmem>>) attributes {dimension_semantics = [#tpu.dimension_semantics<parallel>], iteration_bounds = array<i64: 1>, scalar_prefetch = 0 : i64, scratch_operands = 0 : i64, tpu.core_type = #tpu.core_type<tc>, window_params = [{transform_indices = @transform_0, window_bounds = array<i64: 16, 128>}, {transform_indices = @transform_1, window_bounds = array<i64: 16, 128>}, {pipeline_mode = #tpu.pipeline_mode<synchronous>, transform_indices = @transform_2, window_bounds = array<i64: 128, 128>}, {pipeline_mode = #tpu.pipeline_mode<synchronous>, transform_indices = @transform_3, window_bounds = array<i64: 1, 128>}, {pipeline_mode = #tpu.pipeline_mode<synchronous>, transform_indices = @transform_4, window_bounds = array<i64: 128, 128>}, {pipeline_mode = #tpu.pipeline_mode<synchronous>, transform_indices = @transform_5, window_bounds = array<i64: 1, 128>}, {pipeline_mode = #tpu.pipeline_mode<synchronous>, transform_indices = @transform_6, window_bounds = array<i64: 128, 128>}, {pipeline_mode = #tpu.pipeline_mode<synchronous>, transform_indices = @transform_7, window_bounds = array<i64: 1, 128>}, {pipeline_mode = #tpu.pipeline_mode<synchronous>, transform_indices = @transform_8, window_bounds = array<i64: 1, 128>}, {transform_indices = @transform_9, window_bounds = array<i64: 16, 128>}]} {
    %c0 = arith.constant 0 : index
    %c0_0 = arith.constant 0 : index
    %0 = vector.load %arg1[%c0, %c0_0] : memref<16x128xbf16, #tpu.memory_space<vmem>>, vector<16x128xbf16>
    %c0_1 = arith.constant 0 : index
    %c0_2 = arith.constant 0 : index
    %1 = vector.load %arg3[%c0_1, %c0_2] : memref<128x128xbf16, #tpu.memory_space<vmem>>, vector<128x128xbf16>
    %cst = arith.constant dense<0.000000e+00> : vector<16x128xf32>
    %2 = tpu.matmul %0, %1, %cst {dimension_numbers = #tpu.dot_dimension_numbers<[1], [0], [0], [1], [0, 0, 1, 1], [], []>} : vector<16x128xbf16>, vector<128x128xbf16>, vector<16x128xf32> -> vector<16x128xf32>
    %c0_3 = arith.constant 0 : index
    %c0_4 = arith.constant 0 : index
    %3 = vector.load %arg4[%c0_3, %c0_4] : memref<1x128xf32, #tpu.memory_space<vmem>>, vector<1x128xf32>
    %4 = vector.broadcast %3 : vector<1x128xf32> to vector<16x128xf32>
    %5 = arith.addf %2, %4 : vector<16x128xf32>
    %cst_5 = arith.constant 0.000000e+00 : f32
    %6 = vector.broadcast %cst_5 : f32 to vector<16x128xf32>
    %7 = arith.cmpf oge, %5, %6 : vector<16x128xf32>
    %cst_6 = arith.constant 2.000000e-01 : f32
    %8 = vector.broadcast %cst_6 : f32 to vector<16x128xf32>
    %9 = arith.mulf %8, %5 : vector<16x128xf32>
    %10 = arith.select %7, %5, %9 : vector<16x128xi1>, vector<16x128xf32>
    %11 = arith.truncf %10 : vector<16x128xf32> to vector<16x128xbf16>
    %c0_7 = arith.constant 0 : index
    %c0_8 = arith.constant 0 : index
    %12 = vector.load %arg5[%c0_7, %c0_8] : memref<128x128xbf16, #tpu.memory_space<vmem>>, vector<128x128xbf16>
    %cst_9 = arith.constant dense<0.000000e+00> : vector<16x128xf32>
    %13 = tpu.matmul %11, %12, %cst_9 {dimension_numbers = #tpu.dot_dimension_numbers<[1], [0], [0], [1], [0, 0, 1, 1], [], []>} : vector<16x128xbf16>, vector<128x128xbf16>, vector<16x128xf32> -> vector<16x128xf32>
    %c0_10 = arith.constant 0 : index
    %c0_11 = arith.constant 0 : index
    %14 = vector.load %arg6[%c0_10, %c0_11] : memref<1x128xf32, #tpu.memory_space<vmem>>, vector<1x128xf32>
    %15 = vector.broadcast %14 : vector<1x128xf32> to vector<16x128xf32>
    %16 = arith.addf %13, %15 : vector<16x128xf32>
    %cst_12 = arith.constant 0.000000e+00 : f32
    %17 = vector.broadcast %cst_12 : f32 to vector<16x128xf32>
    %18 = arith.cmpf oge, %16, %17 : vector<16x128xf32>
    %cst_13 = arith.constant 2.000000e-01 : f32
    %19 = vector.broadcast %cst_13 : f32 to vector<16x128xf32>
    %20 = arith.mulf %19, %16 : vector<16x128xf32>
    %21 = arith.select %18, %16, %20 : vector<16x128xi1>, vector<16x128xf32>
    %22 = arith.truncf %21 : vector<16x128xf32> to vector<16x128xbf16>
    %c0_14 = arith.constant 0 : index
    %c0_15 = arith.constant 0 : index
    %23 = vector.load %arg7[%c0_14, %c0_15] : memref<128x128xbf16, #tpu.memory_space<vmem>>, vector<128x128xbf16>
    %cst_16 = arith.constant dense<0.000000e+00> : vector<16x128xf32>
    %24 = tpu.matmul %22, %23, %cst_16 {dimension_numbers = #tpu.dot_dimension_numbers<[1], [0], [0], [1], [0, 0, 1, 1], [], []>} : vector<16x128xbf16>, vector<128x128xbf16>, vector<16x128xf32> -> vector<16x128xf32>
    %c0_17 = arith.constant 0 : index
    %c0_18 = arith.constant 0 : index
    %25 = vector.load %arg8[%c0_17, %c0_18] : memref<1x128xf32, #tpu.memory_space<vmem>>, vector<1x128xf32>
    %26 = vector.broadcast %25 : vector<1x128xf32> to vector<16x128xf32>
    %27 = arith.addf %24, %26 : vector<16x128xf32>
    %c0_19 = arith.constant 0 : index
    %c0_20 = arith.constant 0 : index
    %28 = vector.load %arg2[%c0_19, %c0_20] : memref<16x128xbf16, #tpu.memory_space<vmem>>, vector<16x128xbf16>
    %29 = arith.extf %28 : vector<16x128xbf16> to vector<16x128xf32>
    %30 = arith.mulf %29, %27 : vector<16x128xf32>
    %cst_21 = arith.constant dense<0.000000e+00> : vector<16xf32>
    %31 = vector.multi_reduction <add>, %30, %cst_21 [1] : vector<16x128xf32> to vector<16xf32>
    %32 = vector.shape_cast %31 : vector<16xf32> to vector<16x1xf32>
    %c0_22 = arith.constant 0 : index
    %c0_23 = arith.constant 0 : index
    %33 = vector.load %arg9[%c0_22, %c0_23] : memref<1x128xf32, #tpu.memory_space<vmem>>, vector<1x128xf32>
    %34 = vector.broadcast %32 : vector<16x1xf32> to vector<16x128xf32>
    %35 = vector.broadcast %33 : vector<1x128xf32> to vector<16x128xf32>
    %36 = arith.mulf %34, %35 : vector<16x128xf32>
    %37 = arith.addf %27, %36 : vector<16x128xf32>
    %38 = arith.truncf %37 : vector<16x128xf32> to vector<16x128xbf16>
    %c0_24 = arith.constant 0 : index
    %c0_25 = arith.constant 0 : index
    %39 = vector.load %arg10[%c0_24, %c0_25] : memref<16x128xbf16, #tpu.memory_space<vmem>>, vector<16x128xbf16>
    tpu.vector_store %arg10[%c0_24, %c0_25], %38 {strides = array<i32>} : memref<16x128xbf16, #tpu.memory_space<vmem>>, vector<16x128xbf16>,
    return
  }
  func.func @transform_0(%arg0: i32) -> (i32, i32) {
    %c0_i32 = arith.constant 0 : i32
    %c0_i32_0 = arith.constant 0 : i32
    return %arg0, %c0_i32 : i32, i32
  }
  func.func @transform_1(%arg0: i32) -> (i32, i32) {
    %c0_i32 = arith.constant 0 : i32
    %c0_i32_0 = arith.constant 0 : i32
    return %arg0, %c0_i32 : i32, i32
  }
  func.func @transform_2(%arg0: i32) -> (i32, i32) {
    %c0_i32 = arith.constant 0 : i32
    %c0_i32_0 = arith.constant 0 : i32
    %c0_i32_1 = arith.constant 0 : i32
    return %c0_i32, %c0_i32_0 : i32, i32
  }
  func.func @transform_3(%arg0: i32) -> (i32, i32) {
    %c0_i32 = arith.constant 0 : i32
    %c0_i32_0 = arith.constant 0 : i32
    %c0_i32_1 = arith.constant 0 : i32
    return %c0_i32, %c0_i32_0 : i32, i32
  }
  func.func @transform_4(%arg0: i32) -> (i32, i32) {
    %c0_i32 = arith.constant 0 : i32
    %c0_i32_0 = arith.constant 0 : i32
    %c0_i32_1 = arith.constant 0 : i32
    return %c0_i32, %c0_i32_0 : i32, i32
  }
  func.func @transform_5(%arg0: i32) -> (i32, i32) {
    %c0_i32 = arith.constant 0 : i32
    %c0_i32_0 = arith.constant 0 : i32
    %c0_i32_1 = arith.constant 0 : i32
    return %c0_i32, %c0_i32_0 : i32, i32
  }
  func.func @transform_6(%arg0: i32) -> (i32, i32) {
    %c0_i32 = arith.constant 0 : i32
    %c0_i32_0 = arith.constant 0 : i32
    %c0_i32_1 = arith.constant 0 : i32
    return %c0_i32, %c0_i32_0 : i32, i32
  }
  func.func @transform_7(%arg0: i32) -> (i32, i32) {
    %c0_i32 = arith.constant 0 : i32
    %c0_i32_0 = arith.constant 0 : i32
    %c0_i32_1 = arith.constant 0 : i32
    return %c0_i32, %c0_i32_0 : i32, i32
  }
  func.func @transform_8(%arg0: i32) -> (i32, i32) {
    %c0_i32 = arith.constant 0 : i32
    %c0_i32_0 = arith.constant 0 : i32
    %c0_i32_1 = arith.constant 0 : i32
    return %c0_i32, %c0_i32_0 : i32, i32
  }
  func.func @transform_9(%arg0: i32) -> (i32, i32) {
    %c0_i32 = arith.constant 0 : i32
    %c0_i32_0 = arith.constant 0 : i32
    return %arg0, %c0_i32 : i32, i32
  }
}

module attributes {stable_mosaic.version = 11 : i64} {
  func.func @discriminator_kernel(%arg0: i32, %arg1: memref<16x128xbf16, #tpu.memory_space<vmem>>, %arg2: memref<16x128xbf16, #tpu.memory_space<vmem>>, %arg3: memref<128x128xbf16, #tpu.memory_space<vmem>>, %arg4: memref<1x128xf32, #tpu.memory_space<vmem>>, %arg5: memref<128x128xbf16, #tpu.memory_space<vmem>>, %arg6: memref<1x128xf32, #tpu.memory_space<vmem>>, %arg7: memref<128x128xbf16, #tpu.memory_space<vmem>>, %arg8: memref<1x128xf32, #tpu.memory_space<vmem>>, %arg9: memref<1x128xf32, #tpu.memory_space<vmem>>, %arg10: memref<16x128xbf16, #tpu.memory_space<vmem>>) attributes {dimension_semantics = [#tpu.dimension_semantics<parallel>], iteration_bounds = array<i64: 1>, scalar_prefetch = 0 : i64, scratch_operands = 0 : i64, tpu.core_type = #tpu.core_type<tc>, window_params = [{transform_indices = @transform_0, window_bounds = array<i64: 16, 128>}, {transform_indices = @transform_1, window_bounds = array<i64: 16, 128>}, {pipeline_mode = #tpu.pipeline_mode<synchronous>, transform_indices = @transform_2, window_bounds = array<i64: 128, 128>}, {pipeline_mode = #tpu.pipeline_mode<synchronous>, transform_indices = @transform_3, window_bounds = array<i64: 1, 128>}, {pipeline_mode = #tpu.pipeline_mode<synchronous>, transform_indices = @transform_4, window_bounds = array<i64: 128, 128>}, {pipeline_mode = #tpu.pipeline_mode<synchronous>, transform_indices = @transform_5, window_bounds = array<i64: 1, 128>}, {pipeline_mode = #tpu.pipeline_mode<synchronous>, transform_indices = @transform_6, window_bounds = array<i64: 128, 128>}, {pipeline_mode = #tpu.pipeline_mode<synchronous>, transform_indices = @transform_7, window_bounds = array<i64: 1, 128>}, {pipeline_mode = #tpu.pipeline_mode<synchronous>, transform_indices = @transform_8, window_bounds = array<i64: 1, 128>}, {transform_indices = @transform_9, window_bounds = array<i64: 16, 128>}]} {
    %c0 = arith.constant 0 : index
    %c0_0 = arith.constant 0 : index
    %0 = vector.load %arg1[%c0, %c0_0] : memref<16x128xbf16, #tpu.memory_space<vmem>>, vector<16x128xbf16>
    %c0_1 = arith.constant 0 : index
    %c0_2 = arith.constant 0 : index
    %1 = vector.load %arg3[%c0_1, %c0_2] : memref<128x128xbf16, #tpu.memory_space<vmem>>, vector<128x128xbf16>
    %cst = arith.constant dense<0.000000e+00> : vector<16x128xf32>
    %2 = tpu.matmul %0, %1, %cst {dimension_numbers = #tpu.dot_dimension_numbers<[1], [0], [0], [1], [0, 0, 1, 1], [], []>} : vector<16x128xbf16>, vector<128x128xbf16>, vector<16x128xf32> -> vector<16x128xf32>
    %c0_3 = arith.constant 0 : index
    %c0_4 = arith.constant 0 : index
    %3 = vector.load %arg4[%c0_3, %c0_4] : memref<1x128xf32, #tpu.memory_space<vmem>>, vector<1x128xf32>
    %4 = vector.broadcast %3 : vector<1x128xf32> to vector<16x128xf32>
    %5 = arith.addf %2, %4 : vector<16x128xf32>
    %cst_5 = arith.constant 0.000000e+00 : f32
    %6 = vector.broadcast %cst_5 : f32 to vector<16x128xf32>
    %7 = arith.cmpf oge, %5, %6 : vector<16x128xf32>
    %cst_6 = arith.constant 2.000000e-01 : f32
    %8 = vector.broadcast %cst_6 : f32 to vector<16x128xf32>
    %9 = arith.mulf %8, %5 : vector<16x128xf32>
    %10 = arith.select %7, %5, %9 : vector<16x128xi1>, vector<16x128xf32>
    %11 = arith.truncf %10 : vector<16x128xf32> to vector<16x128xbf16>
    %c0_7 = arith.constant 0 : index
    %c0_8 = arith.constant 0 : index
    %12 = vector.load %arg5[%c0_7, %c0_8] : memref<128x128xbf16, #tpu.memory_space<vmem>>, vector<128x128xbf16>
    %cst_9 = arith.constant dense<0.000000e+00> : vector<16x128xf32>
    %13 = tpu.matmul %11, %12, %cst_9 {dimension_numbers = #tpu.dot_dimension_numbers<[1], [0], [0], [1], [0, 0, 1, 1], [], []>} : vector<16x128xbf16>, vector<128x128xbf16>, vector<16x128xf32> -> vector<16x128xf32>
    %c0_10 = arith.constant 0 : index
    %c0_11 = arith.constant 0 : index
    %14 = vector.load %arg6[%c0_10, %c0_11] : memref<1x128xf32, #tpu.memory_space<vmem>>, vector<1x128xf32>
    %15 = vector.broadcast %14 : vector<1x128xf32> to vector<16x128xf32>
    %16 = arith.addf %13, %15 : vector<16x128xf32>
    %cst_12 = arith.constant 0.000000e+00 : f32
    %17 = vector.broadcast %cst_12 : f32 to vector<16x128xf32>
    %18 = arith.cmpf oge, %16, %17 : vector<16x128xf32>
    %cst_13 = arith.constant 2.000000e-01 : f32
    %19 = vector.broadcast %cst_13 : f32 to vector<16x128xf32>
    %20 = arith.mulf %19, %16 : vector<16x128xf32>
    %21 = arith.select %18, %16, %20 : vector<16x128xi1>, vector<16x128xf32>
    %22 = arith.truncf %21 : vector<16x128xf32> to vector<16x128xbf16>
    %c0_14 = arith.constant 0 : index
    %c0_15 = arith.constant 0 : index
    %23 = vector.load %arg7[%c0_14, %c0_15] : memref<128x128xbf16, #tpu.memory_space<vmem>>, vector<128x128xbf16>
    %cst_16 = arith.constant dense<0.000000e+00> : vector<16x128xf32>
    %24 = tpu.matmul %22, %23, %cst_16 {dimension_numbers = #tpu.dot_dimension_numbers<[1], [0], [0], [1], [0, 0, 1, 1], [], []>} : vector<16x128xbf16>, vector<128x128xbf16>, vector<16x128xf32> -> vector<16x128xf32>
    %c0_17 = arith.constant 0 : index
    %c0_18 = arith.constant 0 : index
    %25 = vector.load %arg8[%c0_17, %c0_18] : memref<1x128xf32, #tpu.memory_space<vmem>>, vector<1x128xf32>
    %26 = vector.broadcast %25 : vector<1x128xf32> to vector<16x128xf32>
    %27 = arith.addf %24, %26 : vector<16x128xf32>
    %c0_19 = arith.constant 0 : index
    %c0_20 = arith.constant 0 : index
    %28 = vector.load %arg2[%c0_19, %c0_20] : memref<16x128xbf16, #tpu.memory_space<vmem>>, vector<16x128xbf16>
    %29 = arith.extf %28 : vector<16x128xbf16> to vector<16x128xf32>
    %30 = arith.mulf %29, %27 : vector<16x128xf32>
    %cst_21 = arith.constant dense<0.000000e+00> : vector<16xf32>
    %31 = vector.multi_reduction <add>, %30, %cst_21 [1] : vector<16x128xf32> to vector<16xf32>
    %32 = vector.shape_cast %31 : vector<16xf32> to vector<16x1xf32>
    %c0_22 = arith.constant 0 : index
    %c0_23 = arith.constant 0 : index
    %33 = vector.load %arg9[%c0_22, %c0_23] : memref<1x128xf32, #tpu.memory_space<vmem>>, vector<1x128xf32>
    %34 = vector.broadcast %32 : vector<16x1xf32> to vector<16x128xf32>
    %35 = vector.broadcast %33 : vector<1x128xf32> to vector<16x128xf32>
    %36 = arith.mulf %34, %35 : vector<16x128xf32>
    %37 = arith.addf %27, %36 : vector<16x128xf32>
    %38 = arith.truncf %37 : vector<16x128xf32> to vector<16x128xbf16>
    %c0_24 = arith.constant 0 : index
    %c0_25 = arith.constant 0 : index
    %39 = vector.load %arg10[%c0_24, %c0_25] : memref<16x128xbf16, #tpu.memory_space<vmem>>, vector<16x128xbf16>
    tpu.vector_store %arg10[%c0_24, %c0_25], %38 {strides = array<i32>} : memref<16x128xbf16, #tpu.memory_space<vmem>>, vector<16x128xbf16>,
    return
  }
  func.func @transform_0(%arg0: i32) -> (i32, i32) {
    %c0_i32 = arith.constant 0 : i32
    %c0_i32_0 = arith.constant 0 : i32
    return %arg0, %c0_i32 : i32, i32
  }
  func.func @transform_1(%arg0: i32) -> (i32, i32) {
    %c0_i32 = arith.constant 0 : i32
    %c0_i32_0 = arith.constant 0 : i32
    return %arg0, %c0_i32 : i32, i32
  }
  func.func @transform_2(%arg0: i32) -> (i32, i32) {
    %c0_i32 = arith.constant 0 : i32
    %c0_i32_0 = arith.constant 0 : i32
    %c0_i32_1 = arith.constant 0 : i32
    return %c0_i32, %c0_i32_0 : i32, i32
  }
  func.func @transform_3(%arg0: i32) -> (i32, i32) {
    %c0_i32 = arith.constant 0 : i32
    %c0_i32_0 = arith.constant 0 : i32
    %c0_i32_1 = arith.constant 0 : i32
    return %c0_i32, %c0_i32_0 : i32, i32
  }
  func.func @transform_4(%arg0: i32) -> (i32, i32) {
    %c0_i32 = arith.constant 0 : i32
    %c0_i32_0 = arith.constant 0 : i32
    %c0_i32_1 = arith.constant 0 : i32
    return %c0_i32, %c0_i32_0 : i32, i32
  }
  func.func @transform_5(%arg0: i32) -> (i32, i32) {
    %c0_i32 = arith.constant 0 : i32
    %c0_i32_0 = arith.constant 0 : i32
    %c0_i32_1 = arith.constant 0 : i32
    return %c0_i32, %c0_i32_0 : i32, i32
  }
  func.func @transform_6(%arg0: i32) -> (i32, i32) {
    %c0_i32 = arith.constant 0 : i32
    %c0_i32_0 = arith.constant 0 : i32
    %c0_i32_1 = arith.constant 0 : i32
    return %c0_i32, %c0_i32_0 : i32, i32
  }
  func.func @transform_7(%arg0: i32) -> (i32, i32) {
    %c0_i32 = arith.constant 0 : i32
    %c0_i32_0 = arith.constant 0 : i32
    %c0_i32_1 = arith.constant 0 : i32
    return %c0_i32, %c0_i32_0 : i32, i32
  }
  func.func @transform_8(%arg0: i32) -> (i32, i32) {
    %c0_i32 = arith.constant 0 : i32
    %c0_i32_0 = arith.constant 0 : i32
    %c0_i32_1 = arith.constant 0 : i32
    return %c0_i32, %c0_i32_0 : i32, i32
  }
  func.func @transform_9(%arg0: i32) -> (i32, i32) {
    %c0_i32 = arith.constant 0 : i32
    %c0_i32_0 = arith.constant 0 : i32
    return %arg0, %c0_i32 : i32, i32
  }
}

</mosaic_0001>

<bundles_post_ra>
// kernel: tpu_custom_call.1
= control target key start
LH: loop header
LB: loop body
LE: loop exit
PB: predicated region body
PF: predicated region fallthrough
CT: control target
= control target key end

     0   :  { %14 = vsyncpa [#allocation3], 0  ;;  %s1020_s0 = inlined_call_operand.hbm [shape: bf16[16,128], index: 0, kind: input, shape index: {}]   ;;  %s1021_s1 = inlined_call_operand.hbm [shape: bf16[16,128], index: 1, kind: input, shape index: {}]   ;;  %s1022_s2 = inlined_call_operand.hbm [shape: bf16[128,128], index: 2, kind: input, shape index: {}]   ;;  %s1023_s3 = inlined_call_operand.vmem [shape: f32[1,128], index: 3, kind: input, shape index: {}]   ;;  %s1024_s4 = inlined_call_operand.hbm [shape: bf16[128,128], index: 4, kind: input, shape index: {}]   ;;  %s1025_s5 = inlined_call_operand.vmem [shape: f32[1,128], index: 5, kind: input, shape index: {}]   ;;  %s1026_s6 = inlined_call_operand.hbm [shape: bf16[128,128], index: 6, kind: input, shape index: {}]   ;;  %s1027_s7 = inlined_call_operand.vmem [shape: f32[1,128], index: 7, kind: input, shape index: {}]   ;;  %s1028_s8 = inlined_call_operand.vmem [shape: f32[1,128], index: 8, kind: input, shape index: {}]   ;;  %s1029_s9 = inlined_call_operand.hbm [shape: bf16[16,128], index: 9, kind: output, shape index: {}]  }
   0x1   :  { %15 = vsyncpa [#allocation6], 0 }
   0x2   :  { %16 = vsyncpa [#allocation9], 0 }
   0x3   :  { %17 = vsyncpa [#allocation4], 0  ;;  %s814_s30 = smov [#allocation5]   ;;  %s815_s11 = smov [#allocation8]  }
   0x4   :  { %s35_s10 = sshll.u32 %s814_s30, 4  ;;  %s61_s12 = sshll.u32 %s815_s11, 4  ;;  %s36_s10 = int_to_ptr.vmem [resolvable:$true] %s35_s10  ;;  %s874_s12 = int_to_ptr.vmem [resolvable:$true] %s61_s12 }
   0x5   :  { %s674_s15 = scalar_lea.hbm %s1021_s1, 128 }
   0x6   :  { %p675_p0 = scmp.ne.s32.totalorder %s1021_s1, %s674_s15  ;;  %p678_p1 = scmp.lt.u32.totalorder %s674_s15, %s1021_s1 }
   0x8   :  { %p680_p2 = pnand %p678_p1, %p675_p0 }
   0xa   :  { %683 = shalt.err (!%p680_p2)
}
   0xb   :  { %s684_s20 = scalar_lea.vmem %s36_s10, 128  ;;  %p689_p4 = scmp.lt.s32.totalorder %s36_s10, %s36_s10 }
   0xc   :  { %p685_p3 = scmp.ne.s32.totalorder %s36_s10, %s684_s20  ;;  %p690_p5 = scmp.lt.s32.totalorder %s684_s20, %s684_s20 }
   0xe   :  { %p691_p6 = por %p690_p5, %p689_p4 }
  0x10   :  { %p692_p7 = pnand %p691_p6, %p685_p3 }
  0x12   :  { %695 = shalt.err (!%p692_p7)
}
  0x13   :  { %s816_s21 = smov 64   ;;  %s817_s22 = smov 4  }
  0x14   :  { %41 = dma.hbm_to_vmem [thread:$0]  %s1021_s1, 128, %s36_s10, [#allocation6], %s816_s21, %s816_s21, %s817_s22  }
  0x15   :  { %s696_s27 = scalar_lea.hbm %s1024_s4, 1024 }
  0x16   :  { %p697_p8 = scmp.ne.s32.totalorder %s1024_s4, %s696_s27  ;;  %p700_p9 = scmp.lt.u32.totalorder %s696_s27, %s1024_s4 }
  0x18   :  { %p702_p10 = pnand %p700_p9, %p697_p8 }
  0x1a   :  { %705 = shalt.err (!%p702_p10)
}
  0x1b   :  { %s706_s13 = scalar_lea.vmem %s874_s12, 1024  ;;  %p711_p12 = scmp.lt.s32.totalorder %s874_s12, %s874_s12 }
  0x1c   :  { %p707_p11 = scmp.ne.s32.totalorder %s874_s12, %s706_s13  ;;  %p712_p13 = scmp.lt.s32.totalorder %s706_s13, %s706_s13 }
  0x1e   :  { %p713_p0 = por %p712_p13, %p711_p12 }
  0x20   :  { %p714_p1 = pnand %p713_p0, %p707_p11 }
  0x22   :  { %717 = shalt.err (!%p714_p1)
}
  0x23   :  { %67 = dma.hbm_to_vmem [thread:$0]  %s1024_s4, 1024, %s874_s12, [#allocation9], %s816_s21, %s816_s21, %s817_s22  }
  0x24   :  { %s818_s14 = smov [#allocation2]   ;;  %s819_s16 = smov [#allocation7]  }
  0x25   :  { %s23_s15 = sshll.u32 %s818_s14, 4  ;;  %s47_s17 = sshll.u32 %s819_s16, 4  ;;  %s24_s15 = int_to_ptr.vmem [resolvable:$true] %s23_s15  ;;  %s911_s17 = int_to_ptr.vmem [resolvable:$true] %s47_s17 }
  0x26   :  { %s718_s20 = scalar_lea.hbm %s1020_s0, 128 }
  0x27   :  { %p719_p2 = scmp.ne.s32.totalorder %s1020_s0, %s718_s20  ;;  %p722_p3 = scmp.lt.u32.totalorder %s718_s20, %s1020_s0 }
  0x29   :  { %p724_p4 = pnand %p722_p3, %p719_p2 }
  0x2b   :  { %727 = shalt.err (!%p724_p4)
}
  0x2c   :  { %s728_s4 = scalar_lea.vmem %s24_s15, 128  ;;  %p733_p6 = scmp.lt.s32.totalorder %s24_s15, %s24_s15 }
  0x2d   :  { %p729_p5 = scmp.ne.s32.totalorder %s24_s15, %s728_s4  ;;  %p734_p7 = scmp.lt.s32.totalorder %s728_s4, %s728_s4 }
  0x2f   :  { %p735_p8 = por %p734_p7, %p733_p6 }
  0x31   :  { %p736_p9 = pnand %p735_p8, %p729_p5 }
  0x33   :  { %739 = shalt.err (!%p736_p9)
}
  0x34   :  { %29 = dma.hbm_to_vmem [thread:$0]  %s1020_s0, 128, %s24_s15, [#allocation3], %s816_s21, %s816_s21, %s817_s22  }
  0x35   :  { %s740_s30 = scalar_lea.hbm %s1022_s2, 1024 }
  0x36   :  { %p741_p10 = scmp.ne.s32.totalorder %s1022_s2, %s740_s30  ;;  %p744_p11 = scmp.lt.u32.totalorder %s740_s30, %s1022_s2 }
  0x38   :  { %p746_p12 = pnand %p744_p11, %p741_p10 }
  0x3a   :  { %749 = shalt.err (!%p746_p12)
}
  0x3b   :  { %s750_s14 = scalar_lea.vmem %s911_s17, 1024  ;;  %p755_p0 = scmp.lt.s32.totalorder %s911_s17, %s911_s17 }
  0x3c   :  { %p751_p13 = scmp.ne.s32.totalorder %s911_s17, %s750_s14  ;;  %p756_p1 = scmp.lt.s32.totalorder %s750_s14, %s750_s14 }
  0x3e   :  { %p757_p2 = por %p756_p1, %p755_p0 }
  0x40   :  { %p758_p3 = pnand %p757_p2, %p751_p13 }
  0x42   :  { %761 = shalt.err (!%p758_p3)
}
  0x43   :  { %53 = dma.hbm_to_vmem [thread:$0]  %s1022_s2, 1024, %s911_s17, [#allocation6], %s816_s21, %s816_s21, %s817_s22  }
  0x44   :  { %s820_s16 = smov [#allocation10]   ;;  %s762_s23 = scalar_lea.hbm %s1026_s6, 1024 }
  0x45   :  { %s75_s18 = sshll.u32 %s820_s16, 4  ;;  %p763_p4 = scmp.ne.s32.totalorder %s1026_s6, %s762_s23  ;;  %s76_s18 = int_to_ptr.vmem [resolvable:$true] %s75_s18 }
  0x46   :  { %p766_p5 = scmp.lt.u32.totalorder %s762_s23, %s1026_s6 }
  0x48   :  { %p768_p6 = pnand %p766_p5, %p763_p4 }
  0x4a   :  { %771 = shalt.err (!%p768_p6)
}
  0x4b   :  { %s772_s12 = scalar_lea.vmem %s76_s18, 1024  ;;  %p777_p8 = scmp.lt.s32.totalorder %s76_s18, %s76_s18 }
  0x4c   :  { %p773_p7 = scmp.ne.s32.totalorder %s76_s18, %s772_s12  ;;  %p778_p9 = scmp.lt.s32.totalorder %s772_s12, %s772_s12 }
  0x4e   :  { %p779_p10 = por %p778_p9, %p777_p8 }
  0x50   :  { %p780_p11 = pnand %p779_p10, %p773_p7 }
  0x52   :  { %783 = shalt.err (!%p780_p11)
}
  0x53   :  { %81 = dma.hbm_to_vmem [thread:$0]  %s1026_s6, 1024, %s76_s18, [#allocation9], %s816_s21, %s816_s21, %s817_s22  }
  0x54   :  { %806 = dma.done.wait [#allocation3], 128  }
  0x55   :  { %807 = vsyncadd [#allocation3], 4294967168 }
  0x56   :  { %808 = dma.done.wait [#allocation6], 1152  }
  0x57   :  { %809 = vsyncadd [#allocation6], 4294966144 }
  0x58   :  { %810 = dma.done.wait [#allocation9], 2048  }
  0x59   :  { %811 = vsyncadd [#allocation9], 4294965248  ;;  %v821_v0 = vmov 0.0   ;;  %vm822_vm0 = vmmov 0   ;;  %v649_v1 = vld [vmem:[#allocation7] sm:$0xff]   ;;  %v650_v2 = vld [vmem:[#allocation7 + $0x8] sm:$0xff]  }
  0x5a   :  { %579 = vmatprep.subr.bf16.mxu0 %v821_v0  ;;  %595 = vmatprep.mubr.msk.bf16.mxu0 %vm822_vm0, %v821_v0  ;;  %v651_v3 = vld [vmem:[#allocation7 + $0x10] sm:$0xff]   ;;  %v658_v4 = vld [vmem:[#allocation8] sm:$0xff]   ;;  %v652_v5 = vld [vmem:[#allocation7 + $0x18] sm:$0xff]  }
  0x5b   :  { %599 = vmatprep.subr.bf16.mxu1 %v821_v0  ;;  %615 = vmatprep.mubr.msk.bf16.mxu1 %vm822_vm0, %v821_v0  ;;  %v659_v6 = vld [vmem:[#allocation8 + $0x8] sm:$0xff]   ;;  %v653_v7 = vld [vmem:[#allocation7 + $0x20] sm:$0xff]   ;;  %v660_v8 = vld [vmem:[#allocation8 + $0x10] sm:$0xff]  }
  0x5c   :  { %580 = vmatpush3.bf16.msra.mxu0 %v649_v1  ;;  %600 = vmatpush3.bf16.msra.mxu1 %v658_v4  ;;  %v654_v9 = vld [vmem:[#allocation7 + $0x28] sm:$0xff]   ;;  %v661_v10 = vld [vmem:[#allocation8 + $0x18] sm:$0xff]   ;;  %v655_v11 = vld [vmem:[#allocation7 + $0x30] sm:$0xff]  }
  0x5d   :  { %581 = vmatprep.subr.bf16.mxu0 %v821_v0  ;;  %601 = vmatprep.subr.bf16.mxu1 %v821_v0  ;;  %v662_v12 = vld [vmem:[#allocation8 + $0x20] sm:$0xff]   ;;  %v656_v13 = vld [vmem:[#allocation7 + $0x38] sm:$0xff]   ;;  %v663_v14 = vld [vmem:[#allocation8 + $0x28] sm:$0xff]  }
  0x5e   :  { %v657_v15 = vld [vmem:[#allocation2] sm:$0xff]   ;;  %v665_v17 = vld [vmem:[#allocation8 + $0x38] sm:$0xff]   ;;  %v666_v18 = vld [vmem:[#allocation10] sm:$0xff]  }
  0x5f   :  { %v664_v16 = vld [vmem:[#allocation8 + $0x30] sm:$0xff]   ;;  %v667_v19 = vld [vmem:[#allocation10 + $0x8] sm:$0xff]   ;;  %v669_v21 = vld [vmem:[#allocation10 + $0x18] sm:$0xff]  }
  0x60   :  { %582 = vmatpush3.bf16.msra.mxu0 %v650_v2  ;;  %602 = vmatpush3.bf16.msra.mxu1 %v659_v6  ;;  %v668_v20 = vld [vmem:[#allocation10 + $0x10] sm:$0xff]   ;;  %v670_v22 = vld [vmem:[#allocation10 + $0x20] sm:$0xff]   ;;  %v671_v23 = vld [vmem:[#allocation10 + $0x28] sm:$0xff]  }
  0x61   :  { %583 = vmatprep.subr.bf16.mxu0 %v821_v0  ;;  %603 = vmatprep.subr.bf16.mxu1 %v821_v0  ;;  %v510_v24 = vld [vmem:[%s1023_s3] ss:$0 sm:$0xff]  ;;  %v673_v37 = vld [vmem:[#allocation10 + $0x38] sm:$0xff]  }
  0x62   :  { %v672_v36 = vld [vmem:[#allocation10 + $0x30] sm:$0xff]   ;;  %v544_v50 = vld [vmem:[#allocation5] sm:$0xff]  }
  0x63   :  { %v520_v38 = vld [vmem:[%s1025_s5] ss:$0 sm:$0xff]  ;;  %v545_v52 = vunpack.c.l.bf16 %v544_v50  ;;  %v546_v60 = vunpack.c.h.bf16 %v544_v50 }
  0x64   :  { %584 = vmatpush3.bf16.msra.mxu0 %v651_v3  ;;  %604 = vmatpush3.bf16.msra.mxu1 %v660_v8  ;;  %v529_v51 = vld [vmem:[%s1027_s7] ss:$0 sm:$0xff]  ;;  %s823_s7 = smov [#allocation11]  }
  0x65   :  { %585 = vmatprep.subr.bf16.mxu0 %v821_v0  ;;  %605 = vmatprep.subr.bf16.mxu1 %v821_v0  ;;  %v538_v62 = vld [vmem:[%s1028_s8] ss:$0 sm:$0xff]  ;;  %s496_s13 = sshll.u32 %s823_s7, 4  ;;  %s497_s13 = int_to_ptr.vmem [resolvable:$true] %s496_s13 }
  0x66   :  { %s784_s1 = scalar_lea.vmem %s497_s13, 128  ;;  %p789_p13 = scmp.lt.s32.totalorder %s497_s13, %s497_s13 }
  0x67   :  { %p785_p12 = scmp.ne.s32.totalorder %s497_s13, %s784_s1  ;;  %p790_p0 = scmp.lt.s32.totalorder %s784_s1, %s784_s1 }
  0x68   :  { %586 = vmatpush3.bf16.msra.mxu0 %v652_v5  ;;  %606 = vmatpush3.bf16.msra.mxu1 %v661_v10 }
  0x69   :  { %587 = vmatprep.subr.bf16.mxu0 %v821_v0  ;;  %607 = vmatprep.subr.bf16.mxu1 %v821_v0  ;;  %p791_p1 = por %p790_p0, %p789_p13 }
  0x6b   :  { %p792_p2 = pnand %p791_p1, %p785_p12 }
  0x6c   :  { %588 = vmatpush3.bf16.msra.mxu0 %v653_v7  ;;  %608 = vmatpush3.bf16.msra.mxu1 %v662_v12 }
  0x6d   :  { %589 = vmatprep.subr.bf16.mxu0 %v821_v0  ;;  %609 = vmatprep.subr.bf16.mxu1 %v821_v0 }
  0x70   :  { %590 = vmatpush3.bf16.msra.mxu0 %v654_v9  ;;  %610 = vmatpush3.bf16.msra.mxu1 %v663_v14 }
  0x71   :  { %591 = vmatprep.subr.bf16.mxu0 %v821_v0  ;;  %611 = vmatprep.subr.bf16.mxu1 %v821_v0 }
  0x74   :  { %592 = vmatpush3.bf16.msra.mxu0 %v655_v11  ;;  %612 = vmatpush3.bf16.msra.mxu1 %v664_v16 }
  0x75   :  { %593 = vmatprep.subr.bf16.mxu0 %v821_v0  ;;  %613 = vmatprep.subr.bf16.mxu1 %v821_v0 }
  0x78   :  { %594 = vmatpush3.bf16.msra.mxu0 %v656_v13  ;;  %614 = vmatpush3.bf16.msra.mxu1 %v665_v17 }
  0x79   :  { %619 = vmatprep.subr.bf16.mxu0 %v821_v0 }
  0x7b   :  { %596 = vmatmul.mubr.bf16.vlgmr.msra.gmra.mrb[0].mxu0 %v657_v15 }
  0x7c   :  { %635 = vmatprep.mubr.msk.bf16.mxu0 %vm822_vm0, %v821_v0  ;;  %620 = vmatpush3.bf16.msra.mxu0 %v666_v18 }
  0x7d   :  { %621 = vmatprep.subr.bf16.mxu0 %v821_v0 }
  0x80   :  { %622 = vmatpush3.bf16.msra.mxu0 %v667_v19 }
  0x81   :  { %623 = vmatprep.subr.bf16.mxu0 %v821_v0 }
  0x84   :  { %624 = vmatpush3.bf16.msra.mxu0 %v668_v20 }
  0x85   :  { %625 = vmatprep.subr.bf16.mxu0 %v821_v0 }
  0x88   :  { %626 = vmatpush3.bf16.msra.mxu0 %v669_v21 }
  0x89   :  { %627 = vmatprep.subr.bf16.mxu0 %v821_v0 }
  0x8c   :  { %628 = vmatpush3.bf16.msra.mxu0 %v670_v22 }
  0x8d   :  { %629 = vmatprep.subr.bf16.mxu0 %v821_v0 }
  0x90   :  { %630 = vmatpush3.bf16.msra.mxu0 %v671_v23 }
  0x91   :  { %631 = vmatprep.subr.bf16.mxu0 %v821_v0 }
  0x94   :  { %632 = vmatpush3.bf16.msra.mxu0 %v672_v36 }
  0x95   :  { %633 = vmatprep.subr.bf16.mxu0 %v821_v0 }
  0x98   :  { %634 = vmatpush3.bf16.msra.mxu0 %v673_v37 }
 0x14e   :  { %v215_v25 = vpop.f32.mrb[0].mxu0 }
 0x14f   :  { %v216_v26 = vadd.f32 %v510_v24, %v215_v25  ;;  %v597_v27 = vpop.f32.mrb[1].mxu0 }
 0x150   :  { %v218_v28 = vpop.f32.mrb[2].mxu0 }
 0x151   :  { %v224_v29 = vmul.f32 0.2, %v216_v26  ;;  %v219_v30 = vadd.f32 %v510_v24, %v218_v28  ;;  %v598_v31 = vpop.f32.mrb[3].mxu0  ;;  %vm222_vm1 = vcmp.ge.f32.partialorder %v216_v26, 0.0 }
 0x153   :  { %vm223_vm2 = vcmp.ge.f32.partialorder %v219_v30, 0.0  ;;  %v225_v32 = vmul.f32 0.2, %v219_v30  ;;  %v226_v33 = vsel %vm222_vm1, %v216_v26, %v224_v29 }
 0x155   :  { %v227_v34 = vsel %vm223_vm2, %v219_v30, %v225_v32 }
 0x156   :  { %v228_v35 = vpack.c.bf16 %v227_v34, %v226_v33 }
 0x158   :  { %616 = vmatmul.mubr.bf16.vlgmr.msra.gmra.mrb[0].mxu1 %v228_v35 }
 0x22b   :  { %v334_v39 = vpop.f32.mrb[0].mxu1 }
 0x22c   :  { %v335_v40 = vadd.f32 %v520_v38, %v334_v39  ;;  %v617_v41 = vpop.f32.mrb[1].mxu1 }
 0x22d   :  { %v337_v42 = vpop.f32.mrb[2].mxu1 }
 0x22e   :  { %v343_v43 = vmul.f32 0.2, %v335_v40  ;;  %v338_v44 = vadd.f32 %v520_v38, %v337_v42  ;;  %v618_v45 = vpop.f32.mrb[3].mxu1  ;;  %vm341_vm3 = vcmp.ge.f32.partialorder %v335_v40, 0.0 }
 0x230   :  { %vm342_vm4 = vcmp.ge.f32.partialorder %v338_v44, 0.0  ;;  %v344_v46 = vmul.f32 0.2, %v338_v44  ;;  %v345_v47 = vsel %vm341_vm3, %v335_v40, %v343_v43 }
 0x232   :  { %v346_v48 = vsel %vm342_vm4, %v338_v44, %v344_v46 }
 0x233   :  { %v347_v49 = vpack.c.bf16 %v346_v48, %v345_v47 }
 0x235   :  { %636 = vmatmul.mubr.bf16.vlgmr.msra.gmra.mrb[4].mxu0 %v347_v49 }
 0x308   :  { %v453_v53 = vpop.f32.mrb[4].mxu0 }
 0x309   :  { %v454_v54 = vadd.f32 %v529_v51, %v453_v53  ;;  %v637_v55 = vpop.f32.mrb[5].mxu0 }
 0x30a   :  { %v456_v56 = vpop.f32.mrb[6].mxu0 }
 0x30b   :  { %v457_v57 = vadd.f32 %v529_v51, %v456_v56  ;;  %v638_v58 = vpop.f32.mrb[7].mxu0  ;;  %v464_v59 = vmul.f32 %v545_v52, %v454_v54 }
 0x30d   :  { %466 = vadd.xlane.f32.xlu0 %v464_v59  ;;  %v465_v61 = vmul.f32 %v546_v60, %v457_v57 }
 0x311   :  { %468 = vadd.xlane.f32.xlu0 %v465_v61 }
 0x39a   :  { %v467_v63 = vpop.xlane.xlu0 %466 }
 0x39b   :  { %v477_v0 = vmul.f32 %v538_v62, %v467_v63 }
 0x39d   :  { %v479_v3 = vadd.f32 %v477_v0, %v454_v54 }
 0x39e   :  { %v469_v1 = vpop.xlane.xlu0 %468 }
 0x39f   :  { %v478_v2 = vmul.f32 %v538_v62, %v469_v1 }
 0x3a1   :  { %v480_v4 = vadd.f32 %v478_v2, %v457_v57 }
 0x3a3   :  { %v550_v5 = vpack.c.bf16 %v480_v4, %v479_v3 }
 0x3a5   :  { %551 = vst [vmem:[#allocation11] sm:$0xff] %v550_v5  }
 0x3a6   :  { %795 = shalt.err (!%p792_p2)
}
 0x3a7   :  { %s796_s14 = scalar_lea.hbm %s1029_s9, 128 }
 0x3a8   :  { %p797_p3 = scmp.ne.s32.totalorder %s1029_s9, %s796_s14  ;;  %p800_p4 = scmp.lt.u32.totalorder %s796_s14, %s1029_s9 }
 0x3aa   :  { %p802_p5 = pnand %p800_p4, %p797_p3 }
 0x3ac   :  { %805 = shalt.err (!%p802_p5)
}
 0x3ad   :  { %502 = dma.vmem_to_hbm [thread:$0]  %s497_s13, 128, %s1029_s9, [#allocation4], %s816_s21, %s816_s21, %s817_s22  }
 0x3ae   :  { %812 = dma.done.wait [#allocation4], 128  }
 0x3af   :  { %813 = vsyncadd [#allocation4], 4294967168 }
 0x3b0   :  { %506 = vsyncpa [#allocation3], 1 }
 0x3b1   :  { %507 = vsyncpa [#allocation6], 1 }
 0x3b2   :  { %508 = vsyncpa [#allocation9], 1 }
 0x3b3   :  { %509 = vsyncpa [#allocation4], 1 }

// kernel: tpu_custom_call.1
= control target key start
LH: loop header
LB: loop body
LE: loop exit
PB: predicated region body
PF: predicated region fallthrough
CT: control target
= control target key end

     0   :  { %14 = vsyncpa [#allocation3], 0  ;;  %s1020_s0 = inlined_call_operand.hbm [shape: bf16[16,128], index: 0, kind: input, shape index: {}]   ;;  %s1021_s1 = inlined_call_operand.hbm [shape: bf16[16,128], index: 1, kind: input, shape index: {}]   ;;  %s1022_s2 = inlined_call_operand.hbm [shape: bf16[128,128], index: 2, kind: input, shape index: {}]   ;;  %s1023_s3 = inlined_call_operand.vmem [shape: f32[1,128], index: 3, kind: input, shape index: {}]   ;;  %s1024_s4 = inlined_call_operand.hbm [shape: bf16[128,128], index: 4, kind: input, shape index: {}]   ;;  %s1025_s5 = inlined_call_operand.vmem [shape: f32[1,128], index: 5, kind: input, shape index: {}]   ;;  %s1026_s6 = inlined_call_operand.hbm [shape: bf16[128,128], index: 6, kind: input, shape index: {}]   ;;  %s1027_s7 = inlined_call_operand.vmem [shape: f32[1,128], index: 7, kind: input, shape index: {}]   ;;  %s1028_s8 = inlined_call_operand.vmem [shape: f32[1,128], index: 8, kind: input, shape index: {}]   ;;  %s1029_s9 = inlined_call_operand.hbm [shape: bf16[16,128], index: 9, kind: output, shape index: {}]  }
   0x1   :  { %15 = vsyncpa [#allocation6], 0 }
   0x2   :  { %16 = vsyncpa [#allocation9], 0 }
   0x3   :  { %17 = vsyncpa [#allocation4], 0  ;;  %s814_s30 = smov [#allocation5]   ;;  %s815_s11 = smov [#allocation8]  }
   0x4   :  { %s35_s10 = sshll.u32 %s814_s30, 4  ;;  %s61_s12 = sshll.u32 %s815_s11, 4  ;;  %s36_s10 = int_to_ptr.vmem [resolvable:$true] %s35_s10  ;;  %s874_s12 = int_to_ptr.vmem [resolvable:$true] %s61_s12 }
   0x5   :  { %s674_s15 = scalar_lea.hbm %s1021_s1, 128 }
   0x6   :  { %p675_p0 = scmp.ne.s32.totalorder %s1021_s1, %s674_s15  ;;  %p678_p1 = scmp.lt.u32.totalorder %s674_s15, %s1021_s1 }
   0x8   :  { %p680_p2 = pnand %p678_p1, %p675_p0 }
   0xa   :  { %683 = shalt.err (!%p680_p2)
}
   0xb   :  { %s684_s20 = scalar_lea.vmem %s36_s10, 128  ;;  %p689_p4 = scmp.lt.s32.totalorder %s36_s10, %s36_s10 }
   0xc   :  { %p685_p3 = scmp.ne.s32.totalorder %s36_s10, %s684_s20  ;;  %p690_p5 = scmp.lt.s32.totalorder %s684_s20, %s684_s20 }
   0xe   :  { %p691_p6 = por %p690_p5, %p689_p4 }
  0x10   :  { %p692_p7 = pnand %p691_p6, %p685_p3 }
  0x12   :  { %695 = shalt.err (!%p692_p7)
}
  0x13   :  { %s816_s21 = smov 64   ;;  %s817_s22 = smov 4  }
  0x14   :  { %41 = dma.hbm_to_vmem [thread:$0]  %s1021_s1, 128, %s36_s10, [#allocation6], %s816_s21, %s816_s21, %s817_s22  }
  0x15   :  { %s696_s27 = scalar_lea.hbm %s1024_s4, 1024 }
  0x16   :  { %p697_p8 = scmp.ne.s32.totalorder %s1024_s4, %s696_s27  ;;  %p700_p9 = scmp.lt.u32.totalorder %s696_s27, %s1024_s4 }
  0x18   :  { %p702_p10 = pnand %p700_p9, %p697_p8 }
  0x1a   :  { %705 = shalt.err (!%p702_p10)
}
  0x1b   :  { %s706_s13 = scalar_lea.vmem %s874_s12, 1024  ;;  %p711_p12 = scmp.lt.s32.totalorder %s874_s12, %s874_s12 }
  0x1c   :  { %p707_p11 = scmp.ne.s32.totalorder %s874_s12, %s706_s13  ;;  %p712_p13 = scmp.lt.s32.totalorder %s706_s13, %s706_s13 }
  0x1e   :  { %p713_p0 = por %p712_p13, %p711_p12 }
  0x20   :  { %p714_p1 = pnand %p713_p0, %p707_p11 }
  0x22   :  { %717 = shalt.err (!%p714_p1)
}
  0x23   :  { %67 = dma.hbm_to_vmem [thread:$0]  %s1024_s4, 1024, %s874_s12, [#allocation9], %s816_s21, %s816_s21, %s817_s22  }
  0x24   :  { %s818_s14 = smov [#allocation2]   ;;  %s819_s16 = smov [#allocation7]  }
  0x25   :  { %s23_s15 = sshll.u32 %s818_s14, 4  ;;  %s47_s17 = sshll.u32 %s819_s16, 4  ;;  %s24_s15 = int_to_ptr.vmem [resolvable:$true] %s23_s15  ;;  %s911_s17 = int_to_ptr.vmem [resolvable:$true] %s47_s17 }
  0x26   :  { %s718_s20 = scalar_lea.hbm %s1020_s0, 128 }
  0x27   :  { %p719_p2 = scmp.ne.s32.totalorder %s1020_s0, %s718_s20  ;;  %p722_p3 = scmp.lt.u32.totalorder %s718_s20, %s1020_s0 }
  0x29   :  { %p724_p4 = pnand %p722_p3, %p719_p2 }
  0x2b   :  { %727 = shalt.err (!%p724_p4)
}
  0x2c   :  { %s728_s4 = scalar_lea.vmem %s24_s15, 128  ;;  %p733_p6 = scmp.lt.s32.totalorder %s24_s15, %s24_s15 }
  0x2d   :  { %p729_p5 = scmp.ne.s32.totalorder %s24_s15, %s728_s4  ;;  %p734_p7 = scmp.lt.s32.totalorder %s728_s4, %s728_s4 }
  0x2f   :  { %p735_p8 = por %p734_p7, %p733_p6 }
  0x31   :  { %p736_p9 = pnand %p735_p8, %p729_p5 }
  0x33   :  { %739 = shalt.err (!%p736_p9)
}
  0x34   :  { %29 = dma.hbm_to_vmem [thread:$0]  %s1020_s0, 128, %s24_s15, [#allocation3], %s816_s21, %s816_s21, %s817_s22  }
  0x35   :  { %s740_s30 = scalar_lea.hbm %s1022_s2, 1024 }
  0x36   :  { %p741_p10 = scmp.ne.s32.totalorder %s1022_s2, %s740_s30  ;;  %p744_p11 = scmp.lt.u32.totalorder %s740_s30, %s1022_s2 }
  0x38   :  { %p746_p12 = pnand %p744_p11, %p741_p10 }
  0x3a   :  { %749 = shalt.err (!%p746_p12)
}
  0x3b   :  { %s750_s14 = scalar_lea.vmem %s911_s17, 1024  ;;  %p755_p0 = scmp.lt.s32.totalorder %s911_s17, %s911_s17 }
  0x3c   :  { %p751_p13 = scmp.ne.s32.totalorder %s911_s17, %s750_s14  ;;  %p756_p1 = scmp.lt.s32.totalorder %s750_s14, %s750_s14 }
  0x3e   :  { %p757_p2 = por %p756_p1, %p755_p0 }
  0x40   :  { %p758_p3 = pnand %p757_p2, %p751_p13 }
  0x42   :  { %761 = shalt.err (!%p758_p3)
}
  0x43   :  { %53 = dma.hbm_to_vmem [thread:$0]  %s1022_s2, 1024, %s911_s17, [#allocation6], %s816_s21, %s816_s21, %s817_s22  }
  0x44   :  { %s820_s16 = smov [#allocation10]   ;;  %s762_s23 = scalar_lea.hbm %s1026_s6, 1024 }
  0x45   :  { %s75_s18 = sshll.u32 %s820_s16, 4  ;;  %p763_p4 = scmp.ne.s32.totalorder %s1026_s6, %s762_s23  ;;  %s76_s18 = int_to_ptr.vmem [resolvable:$true] %s75_s18 }
  0x46   :  { %p766_p5 = scmp.lt.u32.totalorder %s762_s23, %s1026_s6 }
  0x48   :  { %p768_p6 = pnand %p766_p5, %p763_p4 }
  0x4a   :  { %771 = shalt.err (!%p768_p6)
}
  0x4b   :  { %s772_s12 = scalar_lea.vmem %s76_s18, 1024  ;;  %p777_p8 = scmp.lt.s32.totalorder %s76_s18, %s76_s18 }
  0x4c   :  { %p773_p7 = scmp.ne.s32.totalorder %s76_s18, %s772_s12  ;;  %p778_p9 = scmp.lt.s32.totalorder %s772_s12, %s772_s12 }
  0x4e   :  { %p779_p10 = por %p778_p9, %p777_p8 }
  0x50   :  { %p780_p11 = pnand %p779_p10, %p773_p7 }
  0x52   :  { %783 = shalt.err (!%p780_p11)
}
  0x53   :  { %81 = dma.hbm_to_vmem [thread:$0]  %s1026_s6, 1024, %s76_s18, [#allocation9], %s816_s21, %s816_s21, %s817_s22  }
  0x54   :  { %806 = dma.done.wait [#allocation3], 128  }
  0x55   :  { %807 = vsyncadd [#allocation3], 4294967168 }
  0x56   :  { %808 = dma.done.wait [#allocation6], 1152  }
  0x57   :  { %809 = vsyncadd [#allocation6], 4294966144 }
  0x58   :  { %810 = dma.done.wait [#allocation9], 2048  }
  0x59   :  { %811 = vsyncadd [#allocation9], 4294965248  ;;  %v821_v0 = vmov 0.0   ;;  %vm822_vm0 = vmmov 0   ;;  %v649_v1 = vld [vmem:[#allocation7] sm:$0xff]   ;;  %v650_v2 = vld [vmem:[#allocation7 + $0x8] sm:$0xff]  }
  0x5a   :  { %579 = vmatprep.subr.bf16.mxu0 %v821_v0  ;;  %595 = vmatprep.mubr.msk.bf16.mxu0 %vm822_vm0, %v821_v0  ;;  %v651_v3 = vld [vmem:[#allocation7 + $0x10] sm:$0xff]   ;;  %v658_v4 = vld [vmem:[#allocation8] sm:$0xff]   ;;  %v652_v5 = vld [vmem:[#allocation7 + $0x18] sm:$0xff]  }
  0x5b   :  { %599 = vmatprep.subr.bf16.mxu1 %v821_v0  ;;  %615 = vmatprep.mubr.msk.bf16.mxu1 %vm822_vm0, %v821_v0  ;;  %v659_v6 = vld [vmem:[#allocation8 + $0x8] sm:$0xff]   ;;  %v653_v7 = vld [vmem:[#allocation7 + $0x20] sm:$0xff]   ;;  %v660_v8 = vld [vmem:[#allocation8 + $0x10] sm:$0xff]  }
  0x5c   :  { %580 = vmatpush3.bf16.msra.mxu0 %v649_v1  ;;  %600 = vmatpush3.bf16.msra.mxu1 %v658_v4  ;;  %v654_v9 = vld [vmem:[#allocation7 + $0x28] sm:$0xff]   ;;  %v661_v10 = vld [vmem:[#allocation8 + $0x18] sm:$0xff]   ;;  %v655_v11 = vld [vmem:[#allocation7 + $0x30] sm:$0xff]  }
  0x5d   :  { %581 = vmatprep.subr.bf16.mxu0 %v821_v0  ;;  %601 = vmatprep.subr.bf16.mxu1 %v821_v0  ;;  %v662_v12 = vld [vmem:[#allocation8 + $0x20] sm:$0xff]   ;;  %v656_v13 = vld [vmem:[#allocation7 + $0x38] sm:$0xff]   ;;  %v663_v14 = vld [vmem:[#allocation8 + $0x28] sm:$0xff]  }
  0x5e   :  { %v657_v15 = vld [vmem:[#allocation2] sm:$0xff]   ;;  %v665_v17 = vld [vmem:[#allocation8 + $0x38] sm:$0xff]   ;;  %v666_v18 = vld [vmem:[#allocation10] sm:$0xff]  }
  0x5f   :  { %v664_v16 = vld [vmem:[#allocation8 + $0x30] sm:$0xff]   ;;  %v667_v19 = vld [vmem:[#allocation10 + $0x8] sm:$0xff]   ;;  %v669_v21 = vld [vmem:[#allocation10 + $0x18] sm:$0xff]  }
  0x60   :  { %582 = vmatpush3.bf16.msra.mxu0 %v650_v2  ;;  %602 = vmatpush3.bf16.msra.mxu1 %v659_v6  ;;  %v668_v20 = vld [vmem:[#allocation10 + $0x10] sm:$0xff]   ;;  %v670_v22 = vld [vmem:[#allocation10 + $0x20] sm:$0xff]   ;;  %v671_v23 = vld [vmem:[#allocation10 + $0x28] sm:$0xff]  }
  0x61   :  { %583 = vmatprep.subr.bf16.mxu0 %v821_v0  ;;  %603 = vmatprep.subr.bf16.mxu1 %v821_v0  ;;  %v510_v24 = vld [vmem:[%s1023_s3] ss:$0 sm:$0xff]  ;;  %v673_v37 = vld [vmem:[#allocation10 + $0x38] sm:$0xff]  }
  0x62   :  { %v672_v36 = vld [vmem:[#allocation10 + $0x30] sm:$0xff]   ;;  %v544_v50 = vld [vmem:[#allocation5] sm:$0xff]  }
  0x63   :  { %v520_v38 = vld [vmem:[%s1025_s5] ss:$0 sm:$0xff]  ;;  %v545_v52 = vunpack.c.l.bf16 %v544_v50  ;;  %v546_v60 = vunpack.c.h.bf16 %v544_v50 }
  0x64   :  { %584 = vmatpush3.bf16.msra.mxu0 %v651_v3  ;;  %604 = vmatpush3.bf16.msra.mxu1 %v660_v8  ;;  %v529_v51 = vld [vmem:[%s1027_s7] ss:$0 sm:$0xff]  ;;  %s823_s7 = smov [#allocation11]  }
  0x65   :  { %585 = vmatprep.subr.bf16.mxu0 %v821_v0  ;;  %605 = vmatprep.subr.bf16.mxu1 %v821_v0  ;;  %v538_v62 = vld [vmem:[%s1028_s8] ss:$0 sm:$0xff]  ;;  %s496_s13 = sshll.u32 %s823_s7, 4  ;;  %s497_s13 = int_to_ptr.vmem [resolvable:$true] %s496_s13 }
  0x66   :  { %s784_s1 = scalar_lea.vmem %s497_s13, 128  ;;  %p789_p13 = scmp.lt.s32.totalorder %s497_s13, %s497_s13 }
  0x67   :  { %p785_p12 = scmp.ne.s32.totalorder %s497_s13, %s784_s1  ;;  %p790_p0 = scmp.lt.s32.totalorder %s784_s1, %s784_s1 }
  0x68   :  { %586 = vmatpush3.bf16.msra.mxu0 %v652_v5  ;;  %606 = vmatpush3.bf16.msra.mxu1 %v661_v10 }
  0x69   :  { %587 = vmatprep.subr.bf16.mxu0 %v821_v0  ;;  %607 = vmatprep.subr.bf16.mxu1 %v821_v0  ;;  %p791_p1 = por %p790_p0, %p789_p13 }
  0x6b   :  { %p792_p2 = pnand %p791_p1, %p785_p12 }
  0x6c   :  { %588 = vmatpush3.bf16.msra.mxu0 %v653_v7  ;;  %608 = vmatpush3.bf16.msra.mxu1 %v662_v12 }
  0x6d   :  { %589 = vmatprep.subr.bf16.mxu0 %v821_v0  ;;  %609 = vmatprep.subr.bf16.mxu1 %v821_v0 }
  0x70   :  { %590 = vmatpush3.bf16.msra.mxu0 %v654_v9  ;;  %610 = vmatpush3.bf16.msra.mxu1 %v663_v14 }
  0x71   :  { %591 = vmatprep.subr.bf16.mxu0 %v821_v0  ;;  %611 = vmatprep.subr.bf16.mxu1 %v821_v0 }
  0x74   :  { %592 = vmatpush3.bf16.msra.mxu0 %v655_v11  ;;  %612 = vmatpush3.bf16.msra.mxu1 %v664_v16 }
  0x75   :  { %593 = vmatprep.subr.bf16.mxu0 %v821_v0  ;;  %613 = vmatprep.subr.bf16.mxu1 %v821_v0 }
  0x78   :  { %594 = vmatpush3.bf16.msra.mxu0 %v656_v13  ;;  %614 = vmatpush3.bf16.msra.mxu1 %v665_v17 }
  0x79   :  { %619 = vmatprep.subr.bf16.mxu0 %v821_v0 }
  0x7b   :  { %596 = vmatmul.mubr.bf16.vlgmr.msra.gmra.mrb[0].mxu0 %v657_v15 }
  0x7c   :  { %635 = vmatprep.mubr.msk.bf16.mxu0 %vm822_vm0, %v821_v0  ;;  %620 = vmatpush3.bf16.msra.mxu0 %v666_v18 }
  0x7d   :  { %621 = vmatprep.subr.bf16.mxu0 %v821_v0 }
  0x80   :  { %622 = vmatpush3.bf16.msra.mxu0 %v667_v19 }
  0x81   :  { %623 = vmatprep.subr.bf16.mxu0 %v821_v0 }
  0x84   :  { %624 = vmatpush3.bf16.msra.mxu0 %v668_v20 }
  0x85   :  { %625 = vmatprep.subr.bf16.mxu0 %v821_v0 }
  0x88   :  { %626 = vmatpush3.bf16.msra.mxu0 %v669_v21 }
  0x89   :  { %627 = vmatprep.subr.bf16.mxu0 %v821_v0 }
  0x8c   :  { %628 = vmatpush3.bf16.msra.mxu0 %v670_v22 }
  0x8d   :  { %629 = vmatprep.subr.bf16.mxu0 %v821_v0 }
  0x90   :  { %630 = vmatpush3.bf16.msra.mxu0 %v671_v23 }
  0x91   :  { %631 = vmatprep.subr.bf16.mxu0 %v821_v0 }
  0x94   :  { %632 = vmatpush3.bf16.msra.mxu0 %v672_v36 }
  0x95   :  { %633 = vmatprep.subr.bf16.mxu0 %v821_v0 }
  0x98   :  { %634 = vmatpush3.bf16.msra.mxu0 %v673_v37 }
 0x14e   :  { %v215_v25 = vpop.f32.mrb[0].mxu0 }
 0x14f   :  { %v216_v26 = vadd.f32 %v510_v24, %v215_v25  ;;  %v597_v27 = vpop.f32.mrb[1].mxu0 }
 0x150   :  { %v218_v28 = vpop.f32.mrb[2].mxu0 }
 0x151   :  { %v224_v29 = vmul.f32 0.2, %v216_v26  ;;  %v219_v30 = vadd.f32 %v510_v24, %v218_v28  ;;  %v598_v31 = vpop.f32.mrb[3].mxu0  ;;  %vm222_vm1 = vcmp.ge.f32.partialorder %v216_v26, 0.0 }
 0x153   :  { %vm223_vm2 = vcmp.ge.f32.partialorder %v219_v30, 0.0  ;;  %v225_v32 = vmul.f32 0.2, %v219_v30  ;;  %v226_v33 = vsel %vm222_vm1, %v216_v26, %v224_v29 }
 0x155   :  { %v227_v34 = vsel %vm223_vm2, %v219_v30, %v225_v32 }
 0x156   :  { %v228_v35 = vpack.c.bf16 %v227_v34, %v226_v33 }
 0x158   :  { %616 = vmatmul.mubr.bf16.vlgmr.msra.gmra.mrb[0].mxu1 %v228_v35 }
 0x22b   :  { %v334_v39 = vpop.f32.mrb[0].mxu1 }
 0x22c   :  { %v335_v40 = vadd.f32 %v520_v38, %v334_v39  ;;  %v617_v41 = vpop.f32.mrb[1].mxu1 }
 0x22d   :  { %v337_v42 = vpop.f32.mrb[2].mxu1 }
 0x22e   :  { %v343_v43 = vmul.f32 0.2, %v335_v40  ;;  %v338_v44 = vadd.f32 %v520_v38, %v337_v42  ;;  %v618_v45 = vpop.f32.mrb[3].mxu1  ;;  %vm341_vm3 = vcmp.ge.f32.partialorder %v335_v40, 0.0 }
 0x230   :  { %vm342_vm4 = vcmp.ge.f32.partialorder %v338_v44, 0.0  ;;  %v344_v46 = vmul.f32 0.2, %v338_v44  ;;  %v345_v47 = vsel %vm341_vm3, %v335_v40, %v343_v43 }
 0x232   :  { %v346_v48 = vsel %vm342_vm4, %v338_v44, %v344_v46 }
 0x233   :  { %v347_v49 = vpack.c.bf16 %v346_v48, %v345_v47 }
 0x235   :  { %636 = vmatmul.mubr.bf16.vlgmr.msra.gmra.mrb[4].mxu0 %v347_v49 }
 0x308   :  { %v453_v53 = vpop.f32.mrb[4].mxu0 }
 0x309   :  { %v454_v54 = vadd.f32 %v529_v51, %v453_v53  ;;  %v637_v55 = vpop.f32.mrb[5].mxu0 }
 0x30a   :  { %v456_v56 = vpop.f32.mrb[6].mxu0 }
 0x30b   :  { %v457_v57 = vadd.f32 %v529_v51, %v456_v56  ;;  %v638_v58 = vpop.f32.mrb[7].mxu0  ;;  %v464_v59 = vmul.f32 %v545_v52, %v454_v54 }
 0x30d   :  { %466 = vadd.xlane.f32.xlu0 %v464_v59  ;;  %v465_v61 = vmul.f32 %v546_v60, %v457_v57 }
 0x311   :  { %468 = vadd.xlane.f32.xlu0 %v465_v61 }
 0x39a   :  { %v467_v63 = vpop.xlane.xlu0 %466 }
 0x39b   :  { %v477_v0 = vmul.f32 %v538_v62, %v467_v63 }
 0x39d   :  { %v479_v3 = vadd.f32 %v477_v0, %v454_v54 }
 0x39e   :  { %v469_v1 = vpop.xlane.xlu0 %468 }
 0x39f   :  { %v478_v2 = vmul.f32 %v538_v62, %v469_v1 }
 0x3a1   :  { %v480_v4 = vadd.f32 %v478_v2, %v457_v57 }
 0x3a3   :  { %v550_v5 = vpack.c.bf16 %v480_v4, %v479_v3 }
 0x3a5   :  { %551 = vst [vmem:[#allocation11] sm:$0xff] %v550_v5  }
 0x3a6   :  { %795 = shalt.err (!%p792_p2)
}
 0x3a7   :  { %s796_s14 = scalar_lea.hbm %s1029_s9, 128 }
 0x3a8   :  { %p797_p3 = scmp.ne.s32.totalorder %s1029_s9, %s796_s14  ;;  %p800_p4 = scmp.lt.u32.totalorder %s796_s14, %s1029_s9 }
 0x3aa   :  { %p802_p5 = pnand %p800_p4, %p797_p3 }
 0x3ac   :  { %805 = shalt.err (!%p802_p5)
}
 0x3ad   :  { %502 = dma.vmem_to_hbm [thread:$0]  %s497_s13, 128, %s1029_s9, [#allocation4], %s816_s21, %s816_s21, %s817_s22  }
 0x3ae   :  { %812 = dma.done.wait [#allocation4], 128  }
 0x3af   :  { %813 = vsyncadd [#allocation4], 4294967168 }
 0x3b0   :  { %506 = vsyncpa [#allocation3], 1 }
 0x3b1   :  { %507 = vsyncpa [#allocation6], 1 }
 0x3b2   :  { %508 = vsyncpa [#allocation9], 1 }
 0x3b3   :  { %509 = vsyncpa [#allocation4], 1 }

</bundles_post_ra>
